<compile_context>
chip_gen: v6e
topology: v6e:2x2x1
jax: 0.10.0
libtpu: 0.0.40
codegen_flags: <defaults>
</compile_context>

<pallas_src>
import jax
import jax.numpy as jnp
from jax.experimental import pallas as pl
from jax.experimental.pallas import tpu as pltpu


def _round_up(x: int, m: int) -> int:
    return ((x + m - 1) // m) * m


def _mlp_encoder_kernel(obs_ref, w1_ref, b1_ref, w2_ref, b2_ref,
                        w3_ref, b3_ref, gamma_ref, beta_ref, out_ref):
    # bf16 inputs to the MXU, f32 accumulation.
    x = obs_ref[...].astype(jnp.bfloat16)

    # Linear(obs_dim, 64) + ReLU
    h1 = jnp.dot(x, w1_ref[...], preferred_element_type=jnp.float32) + b1_ref[...]
    h1 = jnp.maximum(h1, 0.0)

    # Linear(64, 64) + ReLU
    h2 = jnp.dot(h1.astype(jnp.bfloat16), w2_ref[...],
                 preferred_element_type=jnp.float32) + b2_ref[...]
    h2 = jnp.maximum(h2, 0.0)

    # Linear(64, latent_dim)
    h3 = jnp.dot(h2.astype(jnp.bfloat16), w3_ref[...],
                 preferred_element_type=jnp.float32) + b3_ref[...]

    # LayerNorm(latent_dim), eps = 1e-5 (PyTorch default, biased variance).
    mean = jnp.mean(h3, axis=-1, keepdims=True)
    centered = h3 - mean
    var = jnp.mean(centered * centered, axis=-1, keepdims=True)
    inv = jax.lax.rsqrt(var + 1e-5)

    out_ref[...] = (centered * inv * gamma_ref[...] + beta_ref[...]).astype(out_ref.dtype)


def random_mlp_encoder(obs, params, *, block_batch: int = 4096,
                       out_dtype=jnp.float32):
    """obs: (B, obs_dim) f32. params: dict (see init_params). Returns (B, latent_dim)."""
    B, obs_dim = obs.shape
    hidden = params["w1"].shape[1]
    latent_dim = params["w3"].shape[1]

    # ---- batch tiling: tile is a multiple of 16 (bf16 sublane packing) ----
    b16 = _round_up(B, 16)
    tm = min(_round_up(block_batch, 16), b16)
    bp = _round_up(B, tm)
    num_tiles = pl.cdiv(bp, tm)

    # Only pad the batch if it does not already divide into tiles; obs stays
    # f32 (the in-kernel bf16 cast is free) so no extra materialized copy.
    obs_p = obs if bp == B else jnp.pad(obs, ((0, bp - B), (0, 0)))

    bf16 = jnp.bfloat16
    w1 = params["w1"].astype(bf16)
    w2 = params["w2"].astype(bf16)
    w3 = params["w3"].astype(bf16)
    b1 = params["b1"].astype(jnp.float32)
    b2 = params["b2"].astype(jnp.float32)
    b3 = params["b3"].astype(jnp.float32)
    gamma = params["gamma"].astype(jnp.float32)
    beta = params["beta"].astype(jnp.float32)

    tiled = lambda r, c: pl.BlockSpec((r, c), lambda i: (i, 0))
    resident = lambda r, c: pl.BlockSpec((r, c), lambda i: (0, 0))

    out_bytes = jnp.dtype(out_dtype).itemsize
    flops = 2 * bp * (obs_dim * hidden + hidden * hidden + hidden * latent_dim)
    bytes_accessed = (bp * obs_dim * 4                     # obs (f32 in)
                      + bp * latent_dim * out_bytes        # compact output
                      + (obs_dim * hidden + hidden * hidden
                         + hidden * latent_dim) * 2        # bf16 weights
                      + (2 * hidden + 3 * latent_dim) * 4)  # biases + LN params
    cost = pl.CostEstimate(flops=flops, transcendentals=bp,
                           bytes_accessed=bytes_accessed)

    out_p = pl.pallas_call(
        _mlp_encoder_kernel,
        out_shape=jax.ShapeDtypeStruct((bp, latent_dim), out_dtype),
        grid=(num_tiles,),
        in_specs=[
            tiled(tm, obs_dim),            # obs (batch-tiled)
            resident(obs_dim, hidden),     # w1
            resident(1, hidden),           # b1
            resident(hidden, hidden),      # w2
            resident(1, hidden),           # b2
            resident(hidden, latent_dim),  # w3
            resident(1, latent_dim),       # b3
            resident(1, latent_dim),       # gamma
            resident(1, latent_dim),       # beta
        ],
        out_specs=tiled(tm, latent_dim),
        compiler_params=pltpu.CompilerParams(
            dimension_semantics=("parallel",),
            vmem_limit_bytes=48 * 1024 * 1024),
        cost_estimate=cost,
    )(obs_p, w1, b1, w2, b2, w3, b3, gamma, beta)

    return out_p if bp == B else out_p[:B]


def init_params(key, obs_dim, latent_dim, hidden=64):
    """Deterministic synthetic init (PyTorch shapes, stored transposed as (in, out))."""
    ks = jax.random.split(key, 6)

    def lin(kw, kb, fan_in, fan_out):
        bound = 1.0 / jnp.sqrt(fan_in)
        w = jax.random.uniform(kw, (fan_in, fan_out), jnp.float32, -bound, bound)
        b = jax.random.uniform(kb, (1, fan_out), jnp.float32, -bound, bound)
        return w, b

    w1, b1 = lin(ks[0], ks[1], obs_dim, hidden)
    w2, b2 = lin(ks[2], ks[3], hidden, hidden)
    w3, b3 = lin(ks[4], ks[5], hidden, latent_dim)
    gamma = jnp.ones((1, latent_dim), jnp.float32)   # LayerNorm weight
    beta = jnp.zeros((1, latent_dim), jnp.float32)   # LayerNorm bias
    return {"w1": w1, "b1": b1, "w2": w2, "b2": b2,
            "w3": w3, "b3": b3, "gamma": gamma, "beta": beta}


def _reference(obs, p):
    """Same math as the kernel (bf16 MXU inputs, f32 accumulation/LayerNorm)."""
    bf = jnp.bfloat16
    h = jnp.dot(obs.astype(bf), p["w1"].astype(bf),
                preferred_element_type=jnp.float32) + p["b1"]
    h = jnp.maximum(h, 0.0)
    h = jnp.dot(h.astype(bf), p["w2"].astype(bf),
                preferred_element_type=jnp.float32) + p["b2"]
    h = jnp.maximum(h, 0.0)
    h = jnp.dot(h.astype(bf), p["w3"].astype(bf),
                preferred_element_type=jnp.float32) + p["b3"]
    mean = jnp.mean(h, axis=-1, keepdims=True)
    var = jnp.mean((h - mean) ** 2, axis=-1, keepdims=True)
    return (h - mean) * jax.lax.rsqrt(var + 1e-5) * p["gamma"] + p["beta"]


if __name__ == "__main__":
    key = jax.random.PRNGKey(0)
    k_obs, k_par = jax.random.split(key)

    batch, obs_dim, latent_dim = 8, 16, 32
    obs = jax.random.normal(k_obs, (batch, obs_dim), jnp.float32)
    params = init_params(k_par, obs_dim, latent_dim)

    out = random_mlp_encoder(obs, params)
    out = jax.block_until_ready(out)

    ref = _reference(obs, params)
    assert out.shape == (batch, latent_dim)
    assert jnp.allclose(out, ref, atol=1e-4, rtol=1e-4), (
        float(jnp.max(jnp.abs(out - ref))))

    print("KERNEL_OK")
</pallas_src>

<mosaic_0001>
module attributes {stable_mosaic.version = 11 : i64} {
  func.func @_mlp_encoder_kernel(%arg0: i32, %arg1: memref<16x16xf32, #tpu.memory_space<vmem>>, %arg2: memref<16x64xbf16, #tpu.memory_space<vmem>>, %arg3: memref<1x64xf32, #tpu.memory_space<vmem>>, %arg4: memref<64x64xbf16, #tpu.memory_space<vmem>>, %arg5: memref<1x64xf32, #tpu.memory_space<vmem>>, %arg6: memref<64x32xbf16, #tpu.memory_space<vmem>>, %arg7: memref<1x32xf32, #tpu.memory_space<vmem>>, %arg8: memref<1x32xf32, #tpu.memory_space<vmem>>, %arg9: memref<1x32xf32, #tpu.memory_space<vmem>>, %arg10: memref<16x32xf32, #tpu.memory_space<vmem>>) attributes {dimension_semantics = [#tpu.dimension_semantics<parallel>], iteration_bounds = array<i64: 1>, scalar_prefetch = 0 : i64, scratch_operands = 0 : i64, tpu.core_type = #tpu.core_type<tc>, window_params = [{transform_indices = @transform_0, window_bounds = array<i64: 16, 16>}, {pipeline_mode = #tpu.pipeline_mode<synchronous>, transform_indices = @transform_1, window_bounds = array<i64: 16, 64>}, {pipeline_mode = #tpu.pipeline_mode<synchronous>, transform_indices = @transform_2, window_bounds = array<i64: 1, 64>}, {pipeline_mode = #tpu.pipeline_mode<synchronous>, transform_indices = @transform_3, window_bounds = array<i64: 64, 64>}, {pipeline_mode = #tpu.pipeline_mode<synchronous>, transform_indices = @transform_4, window_bounds = array<i64: 1, 64>}, {pipeline_mode = #tpu.pipeline_mode<synchronous>, transform_indices = @transform_5, window_bounds = array<i64: 64, 32>}, {pipeline_mode = #tpu.pipeline_mode<synchronous>, transform_indices = @transform_6, window_bounds = array<i64: 1, 32>}, {pipeline_mode = #tpu.pipeline_mode<synchronous>, transform_indices = @transform_7, window_bounds = array<i64: 1, 32>}, {pipeline_mode = #tpu.pipeline_mode<synchronous>, transform_indices = @transform_8, window_bounds = array<i64: 1, 32>}, {transform_indices = @transform_9, window_bounds = array<i64: 16, 32>}]} {
    %c0 = arith.constant 0 : index
    %c0_0 = arith.constant 0 : index
    %0 = vector.load %arg1[%c0, %c0_0] : memref<16x16xf32, #tpu.memory_space<vmem>>, vector<16x16xf32>
    %1 = arith.truncf %0 : vector<16x16xf32> to vector<16x16xbf16>
    %c0_1 = arith.constant 0 : index
    %c0_2 = arith.constant 0 : index
    %2 = vector.load %arg2[%c0_1, %c0_2] : memref<16x64xbf16, #tpu.memory_space<vmem>>, vector<16x64xbf16>
    %cst = arith.constant dense<0.000000e+00> : vector<16x64xf32>
    %3 = tpu.matmul %1, %2, %cst {dimension_numbers = #tpu.dot_dimension_numbers<[1], [0], [0], [1], [0, 0, 1, 1], [], []>} : vector<16x16xbf16>, vector<16x64xbf16>, vector<16x64xf32> -> vector<16x64xf32>
    %c0_3 = arith.constant 0 : index
    %c0_4 = arith.constant 0 : index
    %4 = vector.load %arg3[%c0_3, %c0_4] : memref<1x64xf32, #tpu.memory_space<vmem>>, vector<1x64xf32>
    %5 = vector.broadcast %4 : vector<1x64xf32> to vector<16x64xf32>
    %6 = arith.addf %3, %5 : vector<16x64xf32>
    %cst_5 = arith.constant 0.000000e+00 : f32
    %7 = vector.broadcast %cst_5 : f32 to vector<16x64xf32>
    %8 = arith.maximumf %6, %7 : vector<16x64xf32>
    %9 = arith.truncf %8 : vector<16x64xf32> to vector<16x64xbf16>
    %c0_6 = arith.constant 0 : index
    %c0_7 = arith.constant 0 : index
    %10 = vector.load %arg4[%c0_6, %c0_7] : memref<64x64xbf16, #tpu.memory_space<vmem>>, vector<64x64xbf16>
    %cst_8 = arith.constant dense<0.000000e+00> : vector<16x64xf32>
    %11 = tpu.matmul %9, %10, %cst_8 {dimension_numbers = #tpu.dot_dimension_numbers<[1], [0], [0], [1], [0, 0, 1, 1], [], []>} : vector<16x64xbf16>, vector<64x64xbf16>, vector<16x64xf32> -> vector<16x64xf32>
    %c0_9 = arith.constant 0 : index
    %c0_10 = arith.constant 0 : index
    %12 = vector.load %arg5[%c0_9, %c0_10] : memref<1x64xf32, #tpu.memory_space<vmem>>, vector<1x64xf32>
    %13 = vector.broadcast %12 : vector<1x64xf32> to vector<16x64xf32>
    %14 = arith.addf %11, %13 : vector<16x64xf32>
    %cst_11 = arith.constant 0.000000e+00 : f32
    %15 = vector.broadcast %cst_11 : f32 to vector<16x64xf32>
    %16 = arith.maximumf %14, %15 : vector<16x64xf32>
    %17 = arith.truncf %16 : vector<16x64xf32> to vector<16x64xbf16>
    %c0_12 = arith.constant 0 : index
    %c0_13 = arith.constant 0 : index
    %18 = vector.load %arg6[%c0_12, %c0_13] : memref<64x32xbf16, #tpu.memory_space<vmem>>, vector<64x32xbf16>
    %cst_14 = arith.constant dense<0.000000e+00> : vector<16x32xf32>
    %19 = tpu.matmul %17, %18, %cst_14 {dimension_numbers = #tpu.dot_dimension_numbers<[1], [0], [0], [1], [0, 0, 1, 1], [], []>} : vector<16x64xbf16>, vector<64x32xbf16>, vector<16x32xf32> -> vector<16x32xf32>
    %c0_15 = arith.constant 0 : index
    %c0_16 = arith.constant 0 : index
    %20 = vector.load %arg7[%c0_15, %c0_16] : memref<1x32xf32, #tpu.memory_space<vmem>>, vector<1x32xf32>
    %21 = vector.broadcast %20 : vector<1x32xf32> to vector<16x32xf32>
    %22 = arith.addf %19, %21 : vector<16x32xf32>
    %cst_17 = arith.constant dense<0.000000e+00> : vector<16xf32>
    %23 = vector.multi_reduction <add>, %22, %cst_17 [1] : vector<16x32xf32> to vector<16xf32>
    %24 = vector.shape_cast %23 : vector<16xf32> to vector<16x1xf32>
    %cst_18 = arith.constant 3.200000e+01 : f32
    %25 = vector.broadcast %cst_18 : f32 to vector<16x1xf32>
    %26 = arith.divf %24, %25 : vector<16x1xf32>
    %27 = vector.broadcast %26 : vector<16x1xf32> to vector<16x32xf32>
    %28 = arith.subf %22, %27 : vector<16x32xf32>
    %29 = arith.mulf %28, %28 : vector<16x32xf32>
    %cst_19 = arith.constant dense<0.000000e+00> : vector<16xf32>
    %30 = vector.multi_reduction <add>, %29, %cst_19 [1] : vector<16x32xf32> to vector<16xf32>
    %31 = vector.shape_cast %30 : vector<16xf32> to vector<16x1xf32>
    %cst_20 = arith.constant 3.200000e+01 : f32
    %32 = vector.broadcast %cst_20 : f32 to vector<16x1xf32>
    %33 = arith.divf %31, %32 : vector<16x1xf32>
    %cst_21 = arith.constant 9.99999974E-6 : f32
    %34 = vector.broadcast %cst_21 : f32 to vector<16x1xf32>
    %35 = arith.addf %33, %34 : vector<16x1xf32>
    %36 = math.rsqrt %35 : vector<16x1xf32>
    %37 = vector.broadcast %36 : vector<16x1xf32> to vector<16x32xf32>
    %38 = arith.mulf %28, %37 : vector<16x32xf32>
    %c0_22 = arith.constant 0 : index
    %c0_23 = arith.constant 0 : index
    %39 = vector.load %arg8[%c0_22, %c0_23] : memref<1x32xf32, #tpu.memory_space<vmem>>, vector<1x32xf32>
    %40 = vector.broadcast %39 : vector<1x32xf32> to vector<16x32xf32>
    %41 = arith.mulf %38, %40 : vector<16x32xf32>
    %c0_24 = arith.constant 0 : index
    %c0_25 = arith.constant 0 : index
    %42 = vector.load %arg9[%c0_24, %c0_25] : memref<1x32xf32, #tpu.memory_space<vmem>>, vector<1x32xf32>
    %43 = vector.broadcast %42 : vector<1x32xf32> to vector<16x32xf32>
    %44 = arith.addf %41, %43 : vector<16x32xf32>
    %c0_26 = arith.constant 0 : index
    %c0_27 = arith.constant 0 : index
    %45 = vector.load %arg10[%c0_26, %c0_27] : memref<16x32xf32, #tpu.memory_space<vmem>>, vector<16x32xf32>
    tpu.vector_store %arg10[%c0_26, %c0_27], %44 {strides = array<i32>} : memref<16x32xf32, #tpu.memory_space<vmem>>, vector<16x32xf32>,
    return
  }
  func.func @transform_0(%arg0: i32) -> (i32, i32) {
    %c0_i32 = arith.constant 0 : i32
    %c0_i32_0 = arith.constant 0 : i32
    return %arg0, %c0_i32 : i32, i32
  }
  func.func @transform_1(%arg0: i32) -> (i32, i32) {
    %c0_i32 = arith.constant 0 : i32
    %c0_i32_0 = arith.constant 0 : i32
    %c0_i32_1 = arith.constant 0 : i32
    return %c0_i32, %c0_i32_0 : i32, i32
  }
  func.func @transform_2(%arg0: i32) -> (i32, i32) {
    %c0_i32 = arith.constant 0 : i32
    %c0_i32_0 = arith.constant 0 : i32
    %c0_i32_1 = arith.constant 0 : i32
    return %c0_i32, %c0_i32_0 : i32, i32
  }
  func.func @transform_3(%arg0: i32) -> (i32, i32) {
    %c0_i32 = arith.constant 0 : i32
    %c0_i32_0 = arith.constant 0 : i32
    %c0_i32_1 = arith.constant 0 : i32
    return %c0_i32, %c0_i32_0 : i32, i32
  }
  func.func @transform_4(%arg0: i32) -> (i32, i32) {
    %c0_i32 = arith.constant 0 : i32
    %c0_i32_0 = arith.constant 0 : i32
    %c0_i32_1 = arith.constant 0 : i32
    return %c0_i32, %c0_i32_0 : i32, i32
  }
  func.func @transform_5(%arg0: i32) -> (i32, i32) {
    %c0_i32 = arith.constant 0 : i32
    %c0_i32_0 = arith.constant 0 : i32
    %c0_i32_1 = arith.constant 0 : i32
    return %c0_i32, %c0_i32_0 : i32, i32
  }
  func.func @transform_6(%arg0: i32) -> (i32, i32) {
    %c0_i32 = arith.constant 0 : i32
    %c0_i32_0 = arith.constant 0 : i32
    %c0_i32_1 = arith.constant 0 : i32
    return %c0_i32, %c0_i32_0 : i32, i32
  }
  func.func @transform_7(%arg0: i32) -> (i32, i32) {
    %c0_i32 = arith.constant 0 : i32
    %c0_i32_0 = arith.constant 0 : i32
    %c0_i32_1 = arith.constant 0 : i32
    return %c0_i32, %c0_i32_0 : i32, i32
  }
  func.func @transform_8(%arg0: i32) -> (i32, i32) {
    %c0_i32 = arith.constant 0 : i32
    %c0_i32_0 = arith.constant 0 : i32
    %c0_i32_1 = arith.constant 0 : i32
    return %c0_i32, %c0_i32_0 : i32, i32
  }
  func.func @transform_9(%arg0: i32) -> (i32, i32) {
    %c0_i32 = arith.constant 0 : i32
    %c0_i32_0 = arith.constant 0 : i32
    return %arg0, %c0_i32 : i32, i32
  }
}

</mosaic_0001>

<bundles_post_ra>
// kernel: tpu_custom_call.1
= control target key start
LH: loop header
LB: loop body
LE: loop exit
PB: predicated region body
PF: predicated region fallthrough
CT: control target
= control target key end

     0   :  { %14 = vsyncpa [#allocation3], 0  ;;  %s590_s0 = inlined_call_operand.vmem [shape: f32[16,16], index: 0, kind: input, shape index: {}]   ;;  %s591_s1 = inlined_call_operand.hbm [shape: bf16[16,64], index: 1, kind: input, shape index: {}]   ;;  %s592_s2 = inlined_call_operand.vmem [shape: f32[1,64], index: 2, kind: input, shape index: {}]   ;;  %s593_s3 = inlined_call_operand.vmem [shape: bf16[64,64], index: 3, kind: input, shape index: {}]   ;;  %s594_s4 = inlined_call_operand.vmem [shape: f32[1,64], index: 4, kind: input, shape index: {}]   ;;  %s595_s5 = inlined_call_operand.vmem [shape: bf16[64,32], index: 5, kind: input, shape index: {}]   ;;  %s596_s6 = inlined_call_operand.vmem [shape: f32[1,32], index: 6, kind: input, shape index: {}]   ;;  %s597_s7 = inlined_call_operand.vmem [shape: f32[1,32], index: 7, kind: input, shape index: {}]   ;;  %s598_s8 = inlined_call_operand.vmem [shape: f32[1,32], index: 8, kind: input, shape index: {}]   ;;  %s599_s9 = inlined_call_operand.hbm [shape: f32[16,32], index: 9, kind: output, shape index: {}]  }
   0x1   :  { %15 = vsyncpa [#allocation4], 0  ;;  %s473_s30 = smov [#allocation2]  }
   0x2   :  { %s23_s10 = sshll.u32 %s473_s30, 4  ;;  %s24_s10 = int_to_ptr.vmem [resolvable:$true] %s23_s10 }
   0x3   :  { %s437_s11 = scalar_lea.vmem %s24_s10, 128  ;;  %p442_p1 = scmp.lt.s32.totalorder %s24_s10, %s24_s10 }
   0x4   :  { %p438_p0 = scmp.ne.s32.totalorder %s24_s10, %s437_s11  ;;  %p443_p2 = scmp.lt.s32.totalorder %s437_s11, %s437_s11 }
   0x6   :  { %p444_p3 = por %p443_p2, %p442_p1 }
   0x8   :  { %p445_p4 = pnand %p444_p3, %p438_p0 }
   0xa   :  { %448 = shalt.err (!%p445_p4)
}
   0xb   :  { %s474_s12 = smov 64   ;;  %s475_s13 = smov 4  }
   0xc   :  { %29 = dma.hbm_to_vmem [thread:$0]  %s591_s1, 128, %s24_s10, [#allocation3], %s474_s12, %s474_s12, %s475_s13  }
   0xd   :  { %469 = dma.done.wait [#allocation3], 128  }
   0xe   :  { %470 = vsyncadd [#allocation3], 4294967168  ;;  %v476_v0 = vmov 0.0   ;;  %vm477_vm0 = vmmov 0   ;;  %v416_v1 = vld [vmem:[#allocation2] sm:$0xff]   ;;  %v49_v3 = vld [vmem:[%s590_s0 + $0x8] sm:$0xff] }
   0xf   :  { %378 = vmatprep.subr.bf16.mxu0 %v476_v0  ;;  %380 = vmatprep.mubr.msk.bf16.mxu0 %vm477_vm0, %v476_v0  ;;  %v48_v2 = vld [vmem:[%s590_s0] sm:$0xff]  ;;  %vm66_vm1 = vcmask 130048   ;;  %v417_v5 = vld [vmem:[%s593_s3 + $0x18] sm:$0xff]   ;;  %v418_v6 = vld [vmem:[%s593_s3 + $0x10] sm:$0xff]   ;;  %vm153_vm2 = vcmask 523264   ;;  %vm284_vm3 = vcmask 261120  }
  0x10   :  { %384 = vmatprep.subr.bf16.mxu1 %v476_v0  ;;  %392 = vmatprep.mubr.msk.bf16.mxu1 %vm477_vm0, %v476_v0  ;;  %v50_v4 = vpack.c.bf16 %v49_v3, %v48_v2  ;;  %v419_v7 = vld [vmem:[%s593_s3 + $0x8] sm:$0xff]   ;;  %v420_v8 = vld [vmem:[%s593_s3] sm:$0xff]   ;;  %v421_v9 = vld [vmem:[%s595_s5 + $0x18] sm:$0xff]   ;;  %s478_s18 = smov [#allocation5]  }
  0x11   :  { %379 = vmatpush3.bf16.msra.mxu0 %v416_v1  ;;  %385 = vmatpush3.bf16.msra.mxu1 %v417_v5  ;;  %v349_v10 = vld [vmem:[%s592_s2] ss:$0 sm:$0xff]  ;;  %v422_v20 = vld [vmem:[%s595_s5 + $0x10] sm:$0xff]   ;;  %v423_v21 = vld [vmem:[%s595_s5 + $0x8] sm:$0xff]   ;;  %s337_s19 = sshll.u32 %s478_s18, 4  ;;  %s338_s19 = int_to_ptr.vmem [resolvable:$true] %s337_s19 }
  0x12   :  { %396 = vmatprep.subr.bf16.mxu0 %v476_v0  ;;  %386 = vmatprep.subr.bf16.mxu1 %v476_v0  ;;  %v424_v22 = vld [vmem:[%s595_s5] sm:$0xff]   ;;  %s449_s1 = scalar_lea.vmem %s338_s19, 256  ;;  %p454_p6 = scmp.lt.s32.totalorder %s338_s19, %s338_s19 }
  0x13   :  { %v352_v23 = vld [vmem:[%s594_s4] ss:$0 sm:$0xff]  ;;  %p450_p5 = scmp.ne.s32.totalorder %s338_s19, %s449_s1  ;;  %p455_p7 = scmp.lt.s32.totalorder %s449_s1, %s449_s1 }
  0x14   :  { %381 = vmatmul.mubr.msk.bf16.vlgmr.msra.gmra.mxu0 %vm66_vm1, %v50_v4  ;;  %v358_v33 = vld [vmem:[%s596_s6] ss:$0 sm:$0xff] }
  0x15   :  { %404 = vmatprep.mubr.msk.bf16.mxu0 %vm477_vm0, %v476_v0  ;;  %387 = vmatpush3.bf16.msra.mxu1 %v418_v6  ;;  %v364_v59 = vld [vmem:[%s597_s7] ss:$0 sm:$0xff]  ;;  %p456_p8 = por %p455_p7, %p454_p6 }
  0x16   :  { %388 = vmatprep.subr.bf16.mxu1 %v476_v0  ;;  %397 = vmatpush3.bf16.msra.mxu0 %v421_v9  ;;  %v365_v61 = vld [vmem:[%s598_s8] ss:$0 sm:$0xff] }
  0x17   :  { %398 = vmatprep.subr.bf16.mxu0 %v476_v0  ;;  %p457_p9 = pnand %p456_p8, %p450_p5 }
  0x19   :  { %389 = vmatpush3.bf16.msra.mxu1 %v419_v7 }
  0x1a   :  { %390 = vmatprep.subr.bf16.mxu1 %v476_v0  ;;  %399 = vmatpush3.bf16.msra.mxu0 %v422_v20 }
  0x1b   :  { %400 = vmatprep.subr.bf16.mxu0 %v476_v0 }
  0x1d   :  { %391 = vmatpush3.bf16.msra.mxu1 %v420_v8 }
  0x1e   :  { %401 = vmatpush3.bf16.msra.mxu0 %v423_v21 }
  0x1f   :  { %402 = vmatprep.subr.bf16.mxu0 %v476_v0 }
  0x22   :  { %403 = vmatpush3.bf16.msra.mxu0 %v424_v22 }
  0xd4   :  { %v104_v11 = vpop.f32.mrf.mxu0 }
  0xd5   :  { %v105_v13 = vadd.f32 %v349_v10, %v104_v11 }
  0xd6   :  { %v382_v12 = vpop.f32.mrf.mxu0 }
  0xd7   :  { %v111_v17 = vmax.f32 %v105_v13, 0.0 }
  0xd8   :  { %v107_v14 = vpop.f32.mrf.mxu0 }
  0xd9   :  { %v108_v15 = vadd.f32 %v349_v10, %v107_v14 }
  0xda   :  { %v383_v16 = vpop.f32.mrf.mxu0 }
  0xdb   :  { %v112_v18 = vmax.f32 %v108_v15, 0.0 }
  0xdd   :  { %v113_v19 = vpack.c.bf16 %v112_v18, %v111_v17 }
  0xdf   :  { %393 = vmatmul.mubr.msk.bf16.vlgmr.msra.gmra.mxu1 %vm153_vm2, %v113_v19 }
 0x19f   :  { %v191_v24 = vpop.f32.mrf.mxu1 }
 0x1a0   :  { %v192_v26 = vadd.f32 %v352_v23, %v191_v24 }
 0x1a1   :  { %v394_v25 = vpop.f32.mrf.mxu1 }
 0x1a2   :  { %v198_v30 = vmax.f32 %v192_v26, 0.0 }
 0x1a3   :  { %v194_v27 = vpop.f32.mrf.mxu1 }
 0x1a4   :  { %v195_v28 = vadd.f32 %v352_v23, %v194_v27 }
 0x1a5   :  { %v395_v29 = vpop.f32.mrf.mxu1 }
 0x1a6   :  { %v199_v31 = vmax.f32 %v195_v28, 0.0 }
 0x1a8   :  { %v200_v32 = vpack.c.bf16 %v199_v31, %v198_v30 }
 0x1aa   :  { %405 = vmatmul.mubr.msk.bf16.vlgmr.msra.gmra.mxu0 %vm153_vm2, %v200_v32 }
 0x26a   :  { %v277_v34 = vpop.f32.mrf.mxu0 }
 0x26b   :  { %v278_v35 = vadd.f32 %v358_v33, %v277_v34 }
 0x26c   :  { %v406_v36 = vpop.f32.mrf.mxu0 }
 0x26d   :  { %v285_v37 = vsel %vm284_vm3, %v278_v35, 0.0 }
 0x26e   :  { %286 = vadd.xlane.f32.xlu0 %v285_v37  ;;  %v280_v38 = vpop.f32.mrf.mxu0 }
 0x26f   :  { %v281_v39 = vadd.f32 %v358_v33, %v280_v38 }
 0x270   :  { %v407_v40 = vpop.f32.mrf.mxu0 }
 0x271   :  { %v288_v41 = vsel %vm284_vm3, %v281_v39, 0.0 }
 0x272   :  { %289 = vadd.xlane.f32.xlu0 %v288_v41 }
 0x2f7   :  { %v287_v42 = vpop.xlane.xlu0 %286 }
 0x2f8   :  { %v292_v43 = vmul.f32 0.03125, %v287_v42 }
 0x2fa   :  { %v294_v44 = vsub.f32 %v278_v35, %v292_v43 }
 0x2fb   :  { %v290_v45 = vpop.xlane.xlu0 %289 }
 0x2fc   :  { %v293_v46 = vmul.f32 0.03125, %v290_v45  ;;  %v296_v47 = vmul.f32 %v294_v44, %v294_v44 }
 0x2fe   :  { %v295_v48 = vsub.f32 %v281_v39, %v293_v46  ;;  %v298_v49 = vsel %vm284_vm3, %v296_v47, 0.0 }
 0x2ff   :  { %299 = vadd.xlane.f32.xlu1 %v298_v49 }
 0x300   :  { %v297_v50 = vmul.f32 %v295_v48, %v295_v48 }
 0x302   :  { %v301_v51 = vsel %vm284_vm3, %v297_v50, 0.0 }
 0x303   :  { %302 = vadd.xlane.f32.xlu1 %v301_v51 }
 0x388   :  { %v300_v52 = vpop.xlane.xlu1 %299 }
 0x389   :  { %v304_v53 = vmul.f32 0.03125, %v300_v52 }
 0x38b   :  { %v306_v54 = vadd.f32 1e-05, %v304_v53 }
 0x38c   :  { %v303_v55 = vpop.xlane.xlu1 %302 }
 0x38d   :  { %425 = vrsqrt.f32 %v306_v54  ;;  %v305_v56 = vmul.f32 0.03125, %v303_v55 }
 0x38f   :  { %v307_v57 = vadd.f32 1e-05, %v305_v56 }
 0x391   :  { %427 = vrsqrt.f32 %v307_v57 }
 0x39a   :  { %v426_v58 = vpop.eup %425 }
 0x39b   :  { %v310_v60 = vmul.f32 %v426_v58, %v294_v44 }
 0x39d   :  { %v319_v62 = vmul.f32 %v364_v59, %v310_v60 }
 0x39e   :  { %v428_v63 = vpop.eup %427 }
 0x39f   :  { %v311_v0 = vmul.f32 %v428_v63, %v295_v48  ;;  %v328_v1 = vadd.f32 %v365_v61, %v319_v62 }
 0x3a1   :  { %v320_v2 = vmul.f32 %v364_v59, %v311_v0  ;;  %330 = vst.msk [vmem:[#allocation5] sm:$0xff] %vm284_vm3, %v328_v1 }
 0x3a3   :  { %v329_v3 = vadd.f32 %v365_v61, %v320_v2 }
 0x3a5   :  { %331 = vst.msk [vmem:[#allocation5 + $0x8] sm:$0xff] %vm284_vm3, %v329_v3 }
 0x3a6   :  { %460 = shalt.err (!%p457_p9)
}
 0x3a7   :  { %s479_s7 = smov 128   ;;  %s480_s8 = smov 8  }
 0x3a8   :  { %343 = dma.vmem_to_hbm [thread:$0]  %s338_s19, 256, %s599_s9, [#allocation4], %s479_s7, %s479_s7, %s480_s8  }
 0x3a9   :  { %471 = dma.done.wait [#allocation4], 256  }
 0x3aa   :  { %472 = vsyncadd [#allocation4], 4294967040 }
 0x3ab   :  { %347 = vsyncpa [#allocation3], 1 }
 0x3ac   :  { %348 = vsyncpa [#allocation4], 1 }

</bundles_post_ra>
